<compile_context>
chip_gen: v5e
topology: v5e:2x2
jax: 0.10.0
libtpu: 0.0.40
codegen_flags: <defaults>
</compile_context>

<pallas_src>
import functools

import jax
import jax.numpy as jnp
from jax.experimental import pallas as pl
from jax.experimental.pallas import tpu as pltpu


def _round_up(x, m):
    return (x + m - 1) // m * m


def _vmem_capacity_bytes():
    try:
        cap = int(pltpu.get_tpu_info().vmem_capacity_bytes)
        if cap > 0:
            return cap
    except Exception:
        pass
    return 64 * 1024 * 1024  # v7x-safe fallback


def _sobel_gate(x, rows_out, cols_out, approx):
    """x: (nb, R, W) f32 with R >= rows_out + 2 and W >= cols_out + 2."""
    x0 = x[:, 0:rows_out, :]
    x1 = x[:, 1:rows_out + 1, :]
    x2 = x[:, 2:rows_out + 2, :]
    # "* 10" folded into the Sobel coefficients; 0.012 * 10 == 0.12.
    a = 10.0 * x0
    b = 10.0 * x2
    s = a + 20.0 * x1 + b            # 10 * vertical [1, 2, 1]   (grad_x column pass)
    t = a - b                        # 10 * vertical [1, 0, -1]  (grad_y column pass)
    w = cols_out
    grad_x = s[:, :, 2:w + 2] - s[:, :, 0:w]
    grad_y = t[:, :, 0:w] + 2.0 * t[:, :, 1:w + 1] + t[:, :, 2:w + 2]
    center = x1[:, :, 1:w + 1]       # == tensor[:, :, 1:-1, 1:-1]
    g = (jnp.abs(grad_x) + jnp.abs(grad_y) - 0.12) \
        * pl.reciprocal(center, approx=approx) - 6.0
    return jax.nn.sigmoid(g)


def _kernel_single(x_ref, o_ref, *, approx):
    """One batch chunk, whole image per grid step (single H tile)."""
    x = x_ref[...]
    if x.dtype != jnp.float32:
        x = x.astype(jnp.float32)
    o_ref[...] = _sobel_gate(x, o_ref.shape[1], o_ref.shape[2],
                             approx).astype(o_ref.dtype)


def _kernel_tiled(x_ref, halo_ref, o_ref, xbuf_ref, *, approx):
    """One batch chunk x one H tile; 2-row halo comes from a second BlockSpec."""
    th = x_ref.shape[1]
    xbuf_ref[:, 0:th, :] = x_ref[...]          # body rows   [h*th, h*th + th)
    xbuf_ref[:, th:th + 8, :] = halo_ref[...]  # halo rows   [(h+1)*th, +8)
    x = xbuf_ref[...]
    if x.dtype != jnp.float32:
        x = x.astype(jnp.float32)
    o_ref[...] = _sobel_gate(x, o_ref.shape[1], o_ref.shape[2],
                             approx).astype(o_ref.dtype)


@functools.partial(jax.jit, static_argnames=("tile_h", "approx_reciprocal"))
def comp1dgrad(x, *, tile_h=None, approx_reciprocal=True):
    """Pallas implementation of Comp1dgrad.forward.  x: (N, 1, H, W)."""
    N, C, H, W = x.shape
    assert C == 1, "Comp1dgrad conv is defined for a single input channel"
    hc, wc = H - 2, W - 2
    assert hc >= 1 and wc >= 1, "need H >= 3 and W >= 3"

    # ---- per-generation VMEM budget -> H tile (th) and batch chunk (nb) ----
    cap = _vmem_capacity_bytes()
    budget = max(16 * 1024 * 1024, int(cap * 0.6))
    w_pad = _round_up(W, 128)                    # input lane-layout width
    wc_pad = _round_up(wc, 128)                  # output lane-layout width
    # Per (image, row) VMEM bytes per pipeline step: double-buffered input and
    # output blocks plus ~6 live f32 temporaries of tile size.
    per_row = (2 + 6) * w_pad * 4 + 2 * wc_pad * 4

    th_cap = max(8, (budget // per_row) // 8 * 8)
    if tile_h is not None:
        th_cap = max(8, min(th_cap, _round_up(int(tile_h), 8)))
    if hc <= th_cap:
        th, num_h = hc, 1                        # full-dim exemption path
    else:
        num_h = pl.cdiv(hc, th_cap)
        th = _round_up(pl.cdiv(hc, num_h), 8)    # balanced tiles (<=8 rows waste)
        num_h = pl.cdiv(hc, th)

    rows_in = th + (2 if num_h == 1 else 8)
    per_image = per_row * rows_in
    nb_vmem = max(1, budget // per_image)
    # Target >= ~2 MiB of input per grid step (amortize ~0.35us step overhead);
    # keep >= 2 batch chunks when N >= 2 so megacore can shard the batch axis.
    tile_in_bytes = max(1, rows_in * W * x.dtype.itemsize)
    nb_target = max(1, (2 * 1024 * 1024) // tile_in_bytes)
    nb = max(1, min(nb_vmem, nb_target, N))
    if N >= 2:
        nb = max(1, min(nb, N // 2))
    num_n = pl.cdiv(N, nb)                       # remainder chunk allowed

    usage_est = per_image * nb
    vmem_limit = int(min(cap * 0.9, max(32 * 1024 * 1024, 2 * usage_est)))

    x3 = x.reshape(N, H, W)                      # drop channel dim (no copy under jit)

    if num_h == 1:
        kernel = functools.partial(_kernel_single, approx=approx_reciprocal)
        out = pl.pallas_call(
            kernel,
            out_shape=jax.ShapeDtypeStruct((N, hc, wc), x.dtype),
            grid=(num_n,),
            in_specs=[pl.BlockSpec((nb, H, W), lambda n: (n, 0, 0))],
            out_specs=pl.BlockSpec((nb, hc, wc), lambda n: (n, 0, 0)),
            compiler_params=pltpu.CompilerParams(
                dimension_semantics=("parallel",),
                vmem_limit_bytes=vmem_limit,
            ),
        )(x3)
    else:
        th_blocks = th // 8
        last_halo_block = max(0, (H - 1) // 8)   # keep halo block start in-bounds

        def halo_index(n, h):
            # Rows [(h+1)*th, (h+1)*th + 8); clamped for the last tile, where
            # the body block already covers every row the stencil needs.
            return (n, jnp.minimum((h + 1) * th_blocks, last_halo_block), 0)

        kernel = functools.partial(_kernel_tiled, approx=approx_reciprocal)
        out = pl.pallas_call(
            kernel,
            out_shape=jax.ShapeDtypeStruct((N, hc, wc), x.dtype),
            grid=(num_n, num_h),
            in_specs=[
                pl.BlockSpec((nb, th, W), lambda n, h: (n, h, 0)),   # body rows
                pl.BlockSpec((nb, 8, W), halo_index),                # 2-row halo
            ],
            out_specs=pl.BlockSpec((nb, th, wc), lambda n, h: (n, h, 0)),
            scratch_shapes=[pltpu.VMEM((nb, th + 8, W), x.dtype)],
            compiler_params=pltpu.CompilerParams(
                dimension_semantics=("parallel", "arbitrary"),
                vmem_limit_bytes=vmem_limit,
            ),
        )(x3, x3)

    return out.reshape(N, 1, hc, wc)


def comp1dgrad_ref(x):
    """Pure-JAX reference (mirrors the PyTorch forward) for validation."""
    wx = jnp.array([[-1.0, 0.0, 1.0], [-2.0, 0.0, 2.0], [-1.0, 0.0, 1.0]],
                   jnp.float32)[None, None]
    wy = jnp.array([[1.0, 2.0, 1.0], [0.0, 0.0, 0.0], [-1.0, -2.0, -1.0]],
                   jnp.float32)[None, None]
    dn = jax.lax.conv_dimension_numbers(x.shape, wx.shape,
                                        ("NCHW", "OIHW", "NCHW"))
    gx = jnp.abs(jax.lax.conv_general_dilated(x, wx, (1, 1), "VALID",
                                              dimension_numbers=dn))
    gy = jnp.abs(jax.lax.conv_general_dilated(x, wy, (1, 1), "VALID",
                                              dimension_numbers=dn))
    g = (gx + gy - 0.012) / x[:, :, 1:-1, 1:-1] * 10.0 - 6.0
    return jax.nn.sigmoid(g)


if __name__ == "__main__":
    key = jax.random.PRNGKey(0)
    k1, k2, k3 = jax.random.split(key, 3)

    # Case 1: small image -> single-H-tile auto-pipelined path, 2 batch chunks.
    x1 = jax.random.uniform(k1, (2, 1, 16, 16), jnp.float32,
                            minval=0.5, maxval=1.5)
    o1 = jax.block_until_ready(comp1dgrad(x1))
    r1 = jax.block_until_ready(comp1dgrad_ref(x1))
    assert o1.shape == (2, 1, 14, 14)
    # approx reciprocal error is squashed by the saturating sigmoid.
    assert jnp.allclose(o1, r1, atol=1e-2, rtol=1e-2), (
        float(jnp.max(jnp.abs(o1 - r1))))

    # Case 2: forces the multi-H-tile (halo BlockSpec) path with a partial
    # last row tile.
    x2 = jax.random.uniform(k2, (2, 1, 150, 20), jnp.float32,
                            minval=0.5, maxval=1.5)
    o2 = jax.block_until_ready(comp1dgrad(x2, tile_h=64))
    r2 = jax.block_until_ready(comp1dgrad_ref(x2))
    assert o2.shape == (2, 1, 148, 18)
    assert jnp.allclose(o2, r2, atol=1e-2, rtol=1e-2), (
        float(jnp.max(jnp.abs(o2 - r2))))

    # Case 3: odd batch -> remainder batch chunk (nb=2 over N=5).
    x3 = jax.random.uniform(k3, (5, 1, 16, 16), jnp.float32,
                            minval=0.5, maxval=1.5)
    o3 = jax.block_until_ready(comp1dgrad(x3))
    r3 = jax.block_until_ready(comp1dgrad_ref(x3))
    assert o3.shape == (5, 1, 14, 14)
    assert jnp.allclose(o3, r3, atol=1e-2, rtol=1e-2), (
        float(jnp.max(jnp.abs(o3 - r3))))

    print("KERNEL_OK")
</pallas_src>

<mosaic_0001>
module attributes {stable_mosaic.version = 11 : i64} {
  func.func @_kernel_single(%arg0: i32, %arg1: memref<1x16x16xf32, #tpu.memory_space<vmem>>, %arg2: memref<1x14x14xf32, #tpu.memory_space<vmem>>) attributes {dimension_semantics = [#tpu.dimension_semantics<parallel>], iteration_bounds = array<i64: 2>, scalar_prefetch = 0 : i64, scratch_operands = 0 : i64, tpu.core_type = #tpu.core_type<tc>, window_params = [{transform_indices = @transform_0, window_bounds = array<i64: 1, 16, 16>}, {transform_indices = @transform_1, window_bounds = array<i64: 1, 14, 14>}]} {
    %c0 = arith.constant 0 : index
    %c0_0 = arith.constant 0 : index
    %c0_1 = arith.constant 0 : index
    %0 = vector.load %arg1[%c0, %c0_0, %c0_1] : memref<1x16x16xf32, #tpu.memory_space<vmem>>, vector<1x16x16xf32>
    %1 = vector.extract_strided_slice %0 {offsets = [0, 0, 0], sizes = [1, 14, 16], strides = [1, 1, 1]} : vector<1x16x16xf32> to vector<1x14x16xf32>
    %2 = vector.extract_strided_slice %0 {offsets = [0, 1, 0], sizes = [1, 14, 16], strides = [1, 1, 1]} : vector<1x16x16xf32> to vector<1x14x16xf32>
    %3 = vector.extract_strided_slice %0 {offsets = [0, 2, 0], sizes = [1, 14, 16], strides = [1, 1, 1]} : vector<1x16x16xf32> to vector<1x14x16xf32>
    %cst = arith.constant 1.000000e+01 : f32
    %4 = vector.broadcast %cst : f32 to vector<1x14x16xf32>
    %5 = arith.mulf %4, %1 : vector<1x14x16xf32>
    %cst_2 = arith.constant 1.000000e+01 : f32
    %6 = vector.broadcast %cst_2 : f32 to vector<1x14x16xf32>
    %7 = arith.mulf %6, %3 : vector<1x14x16xf32>
    %cst_3 = arith.constant 2.000000e+01 : f32
    %8 = vector.broadcast %cst_3 : f32 to vector<1x14x16xf32>
    %9 = arith.mulf %8, %2 : vector<1x14x16xf32>
    %10 = arith.addf %5, %9 : vector<1x14x16xf32>
    %11 = arith.addf %10, %7 : vector<1x14x16xf32>
    %12 = arith.subf %5, %7 : vector<1x14x16xf32>
    %13 = vector.extract_strided_slice %11 {offsets = [0, 0, 2], sizes = [1, 14, 14], strides = [1, 1, 1]} : vector<1x14x16xf32> to vector<1x14x14xf32>
    %14 = vector.extract_strided_slice %11 {offsets = [0, 0, 0], sizes = [1, 14, 14], strides = [1, 1, 1]} : vector<1x14x16xf32> to vector<1x14x14xf32>
    %15 = arith.subf %13, %14 : vector<1x14x14xf32>
    %16 = vector.extract_strided_slice %12 {offsets = [0, 0, 0], sizes = [1, 14, 14], strides = [1, 1, 1]} : vector<1x14x16xf32> to vector<1x14x14xf32>
    %17 = vector.extract_strided_slice %12 {offsets = [0, 0, 1], sizes = [1, 14, 14], strides = [1, 1, 1]} : vector<1x14x16xf32> to vector<1x14x14xf32>
    %cst_4 = arith.constant 2.000000e+00 : f32
    %18 = vector.broadcast %cst_4 : f32 to vector<1x14x14xf32>
    %19 = arith.mulf %18, %17 : vector<1x14x14xf32>
    %20 = arith.addf %16, %19 : vector<1x14x14xf32>
    %21 = vector.extract_strided_slice %12 {offsets = [0, 0, 2], sizes = [1, 14, 14], strides = [1, 1, 1]} : vector<1x14x16xf32> to vector<1x14x14xf32>
    %22 = arith.addf %20, %21 : vector<1x14x14xf32>
    %23 = vector.extract_strided_slice %2 {offsets = [0, 0, 1], sizes = [1, 14, 14], strides = [1, 1, 1]} : vector<1x14x16xf32> to vector<1x14x14xf32>
    %24 = math.absf %15 : vector<1x14x14xf32>
    %25 = math.absf %22 : vector<1x14x14xf32>
    %26 = arith.addf %24, %25 : vector<1x14x14xf32>
    %cst_5 = arith.constant 1.200000e-01 : f32
    %27 = vector.broadcast %cst_5 : f32 to vector<1x14x14xf32>
    %28 = arith.subf %26, %27 : vector<1x14x14xf32>
    %29 = tpu.reciprocal %23 {approx = true} : vector<1x14x14xf32> -> vector<1x14x14xf32>
    %30 = arith.mulf %28, %29 : vector<1x14x14xf32>
    %cst_6 = arith.constant 6.000000e+00 : f32
    %31 = vector.broadcast %cst_6 : f32 to vector<1x14x14xf32>
    %32 = arith.subf %30, %31 : vector<1x14x14xf32>
    %33 = arith.negf %32 : vector<1x14x14xf32>
    %34 = math.exp %33 : vector<1x14x14xf32>
    %cst_7 = arith.constant 1.000000e+00 : f32
    %35 = vector.broadcast %cst_7 : f32 to vector<1x14x14xf32>
    %36 = arith.addf %35, %34 : vector<1x14x14xf32>
    %37 = arith.divf %35, %36 : vector<1x14x14xf32>
    %c0_8 = arith.constant 0 : index
    %c0_9 = arith.constant 0 : index
    %c0_10 = arith.constant 0 : index
    %38 = vector.load %arg2[%c0_8, %c0_9, %c0_10] : memref<1x14x14xf32, #tpu.memory_space<vmem>>, vector<1x14x14xf32>
    tpu.vector_store %arg2[%c0_8, %c0_9, %c0_10], %37 {strides = array<i32>} : memref<1x14x14xf32, #tpu.memory_space<vmem>>, vector<1x14x14xf32>,
    return
  }
  func.func @transform_0(%arg0: i32) -> (i32, i32, i32) {
    %c0_i32 = arith.constant 0 : i32
    %c0_i32_0 = arith.constant 0 : i32
    %c0_i32_1 = arith.constant 0 : i32
    return %arg0, %c0_i32, %c0_i32_0 : i32, i32, i32
  }
  func.func @transform_1(%arg0: i32) -> (i32, i32, i32) {
    %c0_i32 = arith.constant 0 : i32
    %c0_i32_0 = arith.constant 0 : i32
    %c0_i32_1 = arith.constant 0 : i32
    return %arg0, %c0_i32, %c0_i32_0 : i32, i32, i32
  }
}

</mosaic_0001>

<bundles_post_ra>
// kernel: comp1dgrad.1
= control target key start
LH: loop header
LB: loop body
LE: loop exit
PB: predicated region body
PF: predicated region fallthrough
CT: control target
= control target key end

     0   :  { %6 = vsyncpa [#allocation3], 0  ;;  %s606_s0 = inlined_call_operand.hbm [shape: f32[2,16,16], index: 0, kind: input, shape index: {}]   ;;  %s607_s1 = inlined_call_operand.vmem [shape: f32[2,14,14], index: 1, kind: output, shape index: {}]  }
   0x1   :  { %8 = vsyncpa [#allocation3 + $0x1], 0  ;;  %s508_s6 = smov 0   ;;  %s510_s7 = smov 0  }
   0x2   :  { %s512_s8 = smov 0   ;;  %s514_s9 = smov 0  }
   0x3 LB: > { %s527_s10 = sadd.s32 4294967295, %s490_s9   ;;  %s530_s11 = sadd.s32 1, %s490_s9   ;;  %s490_s9 = sphi %s514_s9, %s614_s9   ;;  %s486_s8 = sphi %s512_s8, %s613_s8   ;;  %s482_s7 = sphi %s510_s7, %s612_s7   ;;  %s478_s6 = sphi %s508_s6, %s611_s6  }
   0x4   : > { %s18_s12 = ssub.s32 %s490_s9, %s530_s11  ;;  %s21_s13 = sadd.s32 1, %s486_s8 }
   0x5   : > { %p19_p0 = scmp.eq.s32.totalorder %s18_s12, 0  ;;  %p28_p1 = scmp.ne.s32.totalorder %s486_s8, %s482_s7 }
   0x6   : > { %p29_p2 = scmp.eq.s32.totalorder %s490_s9, 0  ;;  %p34_p3 = scmp.ne.s32.totalorder %s482_s7, %s478_s6 }
   0x7   : > { %s540_s14 = scalar_select %p19_p0, %s486_s8, %s21_s13  }
   0x8   : > { %p542_p4 = por %p29_p2, %p28_p1  ;;  %p35_p5 = scmp.eq.s32.totalorder %s527_s10, 0 }
   0x9   : > { %p375_p6 = scmp.lt.s32.totalorder %s490_s9, 2  ;;  %s84_s17 = sand.u32 1, %s486_s8  }
   0xa   : > { %p548_p7 = por %p35_p5, %p34_p3  ;;  %s352_s18 = sshll.u32 %s84_s17, 4 }
   0xb   : > { %s367_s19 = sshll.u32 %s490_s9, 4  ;;  %s88_s23 = scalar_lea.vmem [#allocation2], %s352_s18 }
   0xc   : > { %s93_s22 = scalar_lea.hbm %s606_s0, %s367_s19  ;;  %s96_s24 = sshll.u32 %s88_s23, 4  ;;  %s97_s24 = int_to_ptr.vmem [resolvable:$true] %s96_s24 }
   0xd   : > { %s94_s25 = sshll.u32 %s93_s22, 4  ;;  %p559_p8 = pnand %p375_p6, %p542_p4  ;;  %s95_s25 = int_to_ptr.hbm [resolvable:$true] %s94_s25 }
   0xe   : > { %p355_p9 = scmp.ge.s32.totalorder %s490_s9, 1  ;;  %s85_s27 = scalar_lea.sflag [#allocation3], %s84_s17 }
   0xf   : > { %s426_s28 = sshra.s32 %s95_s25, 4  ;;  %p430_p11 = pneg %p559_p8  ;;  %s427_s28 = int_to_ptr.hbm [resolvable:$true] %s426_s28 }
  0x10   : > { %s428_s29 = scalar_lea.hbm %s427_s28, 16  ;;  %s433_s3 = scalar_lea.hbm %s606_s0, 32 }
  0x11   : > { %p429_p10 = scmp.ne.s32.totalorder %s427_s28, %s428_s29  ;;  %p434_p0 = scmp.lt.s32.totalorder %s427_s28, %s606_s0 }
  0x12   : > { %p435_p1 = scmp.lt.s32.totalorder %s433_s3, %s428_s29 }
  0x13   : > { %p431_p12 = pnand %p430_p11, %p429_p10 }
  0x14   : > { %p436_p2 = por %p435_p1, %p434_p0 }
  0x15   : > { %p432_p13 = pneg %p431_p12 }
  0x17   : > { %p437_p3 = pnand %p436_p2, %p432_p13 }
  0x19   : > { %440 = shalt.err (!%p437_p3)
}
  0x1a   : > { %s492_s6 = smov 128   ;;  %s493_s12 = smov 8  }
  0x1b   : > { %374 = dma.hbm_to_vmem [thread:$0]  (!%p559_p8), %s95_s25, 256, %s97_s24, %s85_s27, %s492_s6, %s492_s6, %s493_s12  }
  0x1c   : > { %p104_p4 = scmp.lt.s32.totalorder %s490_s9, 3 }
  0x1e   : > { %p105_p5 = pnand %p355_p9, %p104_p4 }
  0x1f   : > { %s110_s13 = sand.u32 (!%p105_p5), 1, %s482_s7  }
  0x20   : > { %108 = sbr.rel (%p105_p5) target bundleno = 436 (0x1b4), region = 24  ;;  %s356_s15 = sshll.u32 (!%p105_p5), %s110_s13, 4 }
  0x21   : > { %s111_s17 = scalar_lea.sflag (!%p105_p5), [#allocation3], %s110_s13  ;;  %s114_s18 = scalar_lea.vmem (!%p105_p5), [#allocation2], %s356_s15 }
  0x25   : > { %473 = dma.done.wait (%p548_p7), %s111_s17, 256  }
  0x26   : > { %475 = vsyncadd (%p548_p7), %s111_s17, 4294967040  ;;  %v139_v0 = vld [vmem:[%s114_s18] sm:$0xff]  ;;  %v140_v1 = vld [vmem:[%s114_s18 + $0x8] sm:$0xff]  ;;  %vm157_vm0 = vcmask 1045504   ;;  %s494_s9 = smov 126   ;;  %s495_s19 = smov 127  }
  0x27   : > { %v141_v2 = vmul.f32 10.0, %v139_v0  ;;  %v142_v3 = vmul.f32 10.0, %v140_v1  ;;  %v144_v11 = vmul.f32 20.0, %v140_v1  ;;  %v143_v14 = vmul.f32 20.0, %v139_v0  ;;  %s496_s16 = smov 2   ;;  %s497_s20 = smov 1  }
  0x28   : > { %vm147_vm1 = vcmask 1046528   ;;  %414 = vrcp.f32 %v139_v0  ;;  %p134_p6 = scmp.lt.s32.totalorder %s527_s10, 1  ;;  %vm280_vm10 = vcmask 111616   ;;  %vm278_vm11 = vcmask 113664  }
  0x29   : > { %v158_v4 = vrot.slane %v141_v2, 2  ;;  %v159_v5 = vrot.slane %v142_v3, 2  ;;  %v149_v12 = vrot.slane %v144_v11, 1  ;;  %v148_v16 = vrot.slane %v143_v14, 1 }
  0x2a   : > { %416 = vrcp.f32 %v140_v1  ;;  %s616_s10 = smov (!%p134_p6, %s527_s10), 1 }
  0x2b   : > { %v160_v6 = vsel %vm157_vm0, %v158_v4, %v159_v5  ;;  %v166_v9 = vsub.f32 %v142_v3, %v159_v5  ;;  %v154_v13 = vadd.f32 %v149_v12, %v142_v3  ;;  %v150_v17 = vsel %vm147_vm1, %v148_v16, %v149_v12  ;;  %s368_s21 = sshll.u32 %s616_s10, 4 }
  0x2c   : > { %v165_v7 = vsub.f32 %v141_v2, %v160_v6  ;;  %v153_v18 = vadd.f32 %v150_v17, %v141_v2  ;;  %s138_s24 = scalar_lea.vmem %s607_s1, %s368_s21 }
  0x2d   : > { %v178_v10 = vmul.f32 2.0, %v166_v9  ;;  %v164_v15 = vadd.f32 %v159_v5, %v154_v13 }
  0x2e   : > { %v177_v8 = vmul.f32 2.0, %v165_v7  ;;  %191 = vrot.lane.b32.xlu1 %v165_v7, %s494_s9  ;;  %v163_v19 = vadd.f32 %v160_v6, %v153_v18  ;;  %v415_v20 = vpop.eup %414 }
  0x2f   : > { %171 = vrot.lane.b32.xlu2 %v164_v15, %s496_s16  ;;  %v219_v22 = vrot.slane %v415_v20, 1 }
  0x30   : > { %181 = vrot.lane.b32.xlu0 %v177_v8, %s495_s19  ;;  %v417_v21 = vpop.eup %416 }
  0x31   : > { %v220_v24 = vrot.slane %v417_v21, 1 }
  0x33   : > { %v221_v26 = vsel %vm147_vm1, %v219_v22, %v220_v24 }
  0x36   : > { %193 = vrot.lane.b32.xlu1 %v166_v9, %s494_s9 }
  0x37   : > { %169 = vrot.lane.b32.xlu2 %v163_v19, %s496_s16 }
  0x38   : > { %183 = vrot.lane.b32.xlu0 %v178_v10, %s495_s19 }
  0x3f   : > { %222 = vrot.lane.b32.xlu2 %v221_v26, %s497_s20 }
  0x89   : > { %v172_v35 = vpop.permute.xlu2 %171 }
  0x8a   : > { %v176_v42 = vsub.f32 %v164_v15, %v172_v35 }
  0x8c   : > { %v200_v45 = vand.u32 2147483647, %v176_v42 }
  0x91   : > { %v170_v36 = vpop.permute.xlu2 %169 }
  0x92   : > { %v175_v37 = vsub.f32 %v163_v19, %v170_v36 }
  0x94   : > { %v199_v38 = vand.u32 2147483647, %v175_v37 }
  0x99   : > { %v223_v41 = vpop.permute.xlu2 %222 }
  0xa0   : > { %v192_v23 = vpop.permute.xlu1 %191 }
  0xa2   : > { %v182_v25 = vpop.permute.xlu0 %181 }
  0xa3   : > { %v187_v27 = vadd.f32 %v182_v25, %v165_v7 }
  0xa5   : > { %v197_v28 = vadd.f32 %v192_v23, %v187_v27 }
  0xa7   : > { %v201_v29 = vand.u32 2147483647, %v197_v28 }
  0xa8   : > { %v194_v31 = vpop.permute.xlu1 %193 }
  0xa9   : > { %205 = vrot.lane.b32.xlu0 %v201_v29, %s496_s16 }
  0xaa   : > { %v184_v30 = vpop.permute.xlu0 %183 }
  0xab   : > { %v188_v32 = vadd.f32 %v184_v30, %v166_v9 }
  0xad   : > { %v198_v33 = vadd.f32 %v194_v31, %v188_v32 }
  0xaf   : > { %v202_v34 = vand.u32 2147483647, %v198_v33 }
  0xb1   : > { %207 = vrot.lane.b32.xlu1 %v202_v34, %s496_s16  ;;  %224 = vrot.lane.b32.xlu0 %v220_v24, %s497_s20 }
 0x11b   : > { %v206_v39 = vpop.permute.xlu0 %205 }
 0x11c   : > { %v211_v40 = vadd.f32 %v206_v39, %v199_v38 }
 0x11e   : > { %v359_v43 = vadd.f32 -0.12, %v211_v40 }
 0x120   : > { %v228_v44 = vmul.f32 %v359_v43, %v223_v41 }
 0x122   : > { %v361_v46 = vadd.f32 -6.0, %v228_v44 }
 0x123   : > { %v208_v47 = vpop.permute.xlu1 %207  ;;  %v225_v50 = vpop.permute.xlu0 %224 }
 0x124   : > { %v363_v48 = vmul.f32 -1.442695, %v361_v46  ;;  %v212_v49 = vadd.f32 %v208_v47, %v200_v45 }
 0x126   : > { %418 = vpow2.f32 %v363_v48  ;;  %v360_v51 = vadd.f32 -0.12, %v212_v49 }
 0x128   : > { %v229_v52 = vmul.f32 %v360_v51, %v225_v50 }
 0x12a   : > { %v362_v53 = vadd.f32 -6.0, %v229_v52 }
 0x12c   : > { %v419_v54 = vpop.eup %418  ;;  %v364_v55 = vmul.f32 -1.442695, %v362_v53 }
 0x12d   : > { %v238_v56 = vadd.f32 1.0, %v419_v54 }
 0x12e   : > { %420 = vpow2.f32 %v364_v55 }
 0x12f   : > { %422 = vrcp.f32 %v238_v56  ;;  %v251_v62 = vand.u32 2147483648, %v238_v56  ;;  %v249_v0 = vand.u32 2147483647, %v238_v56  ;;  %vm245_vm3 = vweird.f32 %v238_v56 }
 0x131   : > { %v252_v3 = vor.u32 1.1754944e-38, %v251_v62  ;;  %vm250_vm5 = vcmp.eq.f32.partialorder %v249_v0, 8.507059e+37 }
 0x134   : > { %v421_v57 = vpop.eup %420 }
 0x135   : > { %v423_v58 = vpop.eup %422  ;;  %v239_v59 = vadd.f32 1.0, %v421_v57 }
 0x136   : > { %v241_v60 = vmul.f32 %v423_v58, %v238_v56  ;;  %vm246_vm2 = vweird.f32 %v423_v58 }
 0x137   : > { %424 = vrcp.f32 %v239_v59  ;;  %vm247_vm4 = vmor %vm245_vm3, %vm246_vm2  ;;  %v266_v8 = vand.u32 2147483648, %v239_v59  ;;  %v264_v10 = vand.u32 2147483647, %v239_v59  ;;  %vm260_vm7 = vweird.f32 %v239_v59 }
 0x138   : > { %v242_v61 = vsub.f32 1.0, %v241_v60 }
 0x139   : > { %v267_v12 = vor.u32 1.1754944e-38, %v266_v8  ;;  %vm265_vm9 = vcmp.eq.f32.partialorder %v264_v10, 8.507059e+37 }
 0x13a   : > { %v243_v63 = vmul.f32 %v423_v58, %v242_v61 }
 0x13c   : > { %v244_v1 = vadd.f32 %v423_v58, %v243_v63 }
 0x13d   : > { %v425_v2 = vpop.eup %424 }
 0x13e   : > { %v248_v4 = vsel %vm247_vm4, %v423_v58, %v244_v1  ;;  %v256_v5 = vmul.f32 %v425_v2, %v239_v59  ;;  %vm261_vm6 = vweird.f32 %v425_v2 }
 0x13f   : > { %v253_v6 = vsel %vm250_vm5, %v252_v3, %v248_v4  ;;  %vm262_vm8 = vmor %vm260_vm7, %vm261_vm6 }
 0x140   : > { %272 = vrot.lane.b32.xlu1 %v253_v6, %s494_s9  ;;  %v257_v7 = vsub.f32 1.0, %v256_v5 }
 0x142   : > { %v258_v9 = vmul.f32 %v425_v2, %v257_v7 }
 0x144   : > { %v259_v11 = vadd.f32 %v425_v2, %v258_v9 }
 0x146   : > { %v263_v13 = vsel %vm262_vm8, %v425_v2, %v259_v11 }
 0x147   : > { %v268_v14 = vsel %vm265_vm9, %v267_v12, %v263_v13 }
 0x148   : > { %274 = vrot.lane.b32.xlu2 %v268_v14, %s494_s9 }
 0x1a2   : > { %v275_v15 = vpop.permute.xlu2 %274 }
 0x1a3   : > { %281 = vst.msk [vmem:[%s138_s24 + $0x8] sm:$0x3f] %vm280_vm10, %v275_v15 }
 0x1b2   : > { %v273_v16 = vpop.permute.xlu1 %272 }
 0x1b3   : > { %279 = vst.msk [vmem:[%s138_s24] sm:$0xff] %vm278_vm11, %v273_v16 }
 0x1b4 PF: > { %p11_p7 = scmp.ge.s32.totalorder %s530_s11, 4   ;;  %s611_s6 = smov %s482_s7 }
 0x1b5   : > { %s612_s7 = smov %s486_s8  ;;  %s613_s8 = smov %s540_s14 }
 0x1b6   : > { %s614_s9 = smov %s530_s11  ;;  %13 = sbr.rel (!%p11_p7) target bundleno = 3 (0x3), region = 64 }
 0x1bb   :  { %303 = vsyncpa [#allocation3], 1 }
 0x1bc   :  { %305 = vsyncpa [#allocation3 + $0x1], 1 }

</bundles_post_ra>
